<compile_context>
chip_gen: v7x
topology: tpu7x:2x2x1
jax: 0.10.0
libtpu: 0.0.40
codegen_flags: <defaults>
</compile_context>

<pallas_src>
import functools

import jax
import jax.numpy as jnp
from jax.experimental import pallas as pl
from jax.experimental.pallas import tpu as pltpu

HARDTANH_MIN = 1.0 / 48.0
HARDTANH_MAX = 8.0


def _round_up(n, m):
    return (n + m - 1) // m * m


def meta_los_kernel(x_ref, w1_ref, b1_ref, w2_ref, b2_ref, o_ref):
    # Hidden layer: Linear(128 -> 10, zero-padded to 128) + ReLU.
    # MXU matmul (TB, 128) @ (128, 128); padded columns give relu(0 + 0) = 0.
    x = x_ref[...]                                                # (TB, 128)
    h = jnp.dot(x, w1_ref[...], preferred_element_type=jnp.float32)
    h = jnp.maximum(h + b1_ref[...], 0.0)                         # (TB, 128)

    # Output layer computed transposed so the result is lane-dense:
    #   y[0, t] = sum_k w2[0, k] * h[t, k]
    # (zero-padded w2 columns contribute nothing).
    y = jax.lax.dot_general(
        w2_ref[...], h,
        dimension_numbers=(((1,), (1,)), ((), ())),
        preferred_element_type=jnp.float32)                       # (1, TB)
    y = jnp.clip(y + b2_ref[...], HARDTANH_MIN, HARDTANH_MAX)     # hardtanh
    o_ref[...] = y[None].astype(o_ref.dtype)                      # (1, 1, TB)


@functools.partial(jax.jit, static_argnames=("tile_b",))
def meta_los_forward(los_features, w1, b1, w2, b2, *, tile_b=2048):
    """los_features: (B, 128); w1: (10, 128); b1: (10,); w2: (1, 10); b2: (1,)."""
    B, D_in = los_features.shape
    H = w1.shape[0]
    dtype = los_features.dtype

    # --- parameter prep (tiny, zero-pad hidden dim to full 128 lanes) --------
    H_pad = _round_up(H, 128)                                     # 10 -> 128
    w1_pad = jnp.zeros((D_in, H_pad), dtype).at[:, :H].set(w1.T.astype(dtype))
    b1_pad = jnp.zeros((1, H_pad), dtype).at[0, :H].set(b1.astype(dtype))
    w2_pad = jnp.zeros((1, H_pad), dtype).at[0, :H].set(w2.reshape(-1).astype(dtype))
    b2_2d = b2.reshape(1, 1).astype(dtype)

    # --- batch tiling ---------------------------------------------------------
    TB = min(tile_b, _round_up(B, 8))          # block rows, multiple of 8
    B_pad = _round_up(B, TB)
    x = los_features
    if B_pad != B:
        x = jnp.pad(x, ((0, B_pad - B), (0, 0)))
    num_tiles = B_pad // TB

    out3 = pl.pallas_call(
        meta_los_kernel,
        out_shape=jax.ShapeDtypeStruct((num_tiles, 1, TB), dtype),
        grid=(num_tiles,),
        in_specs=[
            pl.BlockSpec((TB, D_in), lambda i: (i, 0)),      # streamed over batch
            pl.BlockSpec((D_in, H_pad), lambda i: (0, 0)),   # resident weights
            pl.BlockSpec((1, H_pad), lambda i: (0, 0)),
            pl.BlockSpec((1, H_pad), lambda i: (0, 0)),
            pl.BlockSpec((1, 1), lambda i: (0, 0)),
        ],
        out_specs=pl.BlockSpec((1, 1, TB), lambda i: (i, 0, 0)),  # lane-dense out
        compiler_params=pltpu.CompilerParams(
            dimension_semantics=("parallel",),   # shard batch across TCs on v7x
        ),
    )(x, w1_pad, b1_pad, w2_pad, b2_2d)

    # (num_tiles, 1, TB) row-major flatten is exactly batch order.
    return out3.reshape(-1)[:B].reshape(B, 1)


def init_params(key):
    """Deterministic init mimicking nn.Linear default (uniform +/- 1/sqrt(fan_in))."""
    k1, k2, k3, k4 = jax.random.split(key, 4)
    bound1 = 1.0 / jnp.sqrt(128.0)
    bound2 = 1.0 / jnp.sqrt(10.0)
    w1 = jax.random.uniform(k1, (10, 128), jnp.float32, -bound1, bound1)
    b1 = jax.random.uniform(k2, (10,), jnp.float32, -bound1, bound1)
    w2 = jax.random.uniform(k3, (1, 10), jnp.float32, -bound2, bound2)
    b2 = jax.random.uniform(k4, (1,), jnp.float32, -bound2, bound2)
    return w1, b1, w2, b2


if __name__ == "__main__":
    key = jax.random.PRNGKey(0)
    k_in, k_par = jax.random.split(key)

    B = 16  # small demo batch; the tiling/pipelining pays off at large B
    los_features = jax.random.normal(k_in, (B, 128), jnp.float32)
    w1, b1, w2, b2 = init_params(k_par)

    out = meta_los_forward(los_features, w1, b1, w2, b2)
    out = jax.block_until_ready(out)

    # Pure-JAX reference check of the same forward pass.
    h_ref = jnp.maximum(los_features @ w1.T + b1, 0.0)
    y_ref = jnp.clip(h_ref @ w2.T + b2, HARDTANH_MIN, HARDTANH_MAX)
    assert out.shape == (B, 1)
    assert jnp.allclose(out, y_ref, atol=1e-5, rtol=1e-5)

    print("KERNEL_OK")
</pallas_src>

<mosaic_0001>
module attributes {stable_mosaic.version = 11 : i64} {
  func.func @meta_los_kernel(%arg0: i32, %arg1: memref<16x128xf32, #tpu.memory_space<vmem>>, %arg2: memref<128x128xf32, #tpu.memory_space<vmem>>, %arg3: memref<1x128xf32, #tpu.memory_space<vmem>>, %arg4: memref<1x128xf32, #tpu.memory_space<vmem>>, %arg5: memref<1x1xf32, #tpu.memory_space<vmem>>, %arg6: memref<1x1x16xf32, #tpu.memory_space<vmem>>) attributes {dimension_semantics = [#tpu.dimension_semantics<parallel>], iteration_bounds = array<i64: 1>, scalar_prefetch = 0 : i64, scratch_operands = 0 : i64, tpu.core_type = #tpu.core_type<tc>, window_params = [{transform_indices = @transform_0, window_bounds = array<i64: 16, 128>}, {pipeline_mode = #tpu.pipeline_mode<synchronous>, transform_indices = @transform_1, window_bounds = array<i64: 128, 128>}, {pipeline_mode = #tpu.pipeline_mode<synchronous>, transform_indices = @transform_2, window_bounds = array<i64: 1, 128>}, {pipeline_mode = #tpu.pipeline_mode<synchronous>, transform_indices = @transform_3, window_bounds = array<i64: 1, 128>}, {pipeline_mode = #tpu.pipeline_mode<synchronous>, transform_indices = @transform_4, window_bounds = array<i64: 1, 1>}, {transform_indices = @transform_5, window_bounds = array<i64: 1, 1, 16>}]} {
    %c0 = arith.constant 0 : index
    %c0_0 = arith.constant 0 : index
    %0 = vector.load %arg1[%c0, %c0_0] : memref<16x128xf32, #tpu.memory_space<vmem>>, vector<16x128xf32>
    %c0_1 = arith.constant 0 : index
    %c0_2 = arith.constant 0 : index
    %1 = vector.load %arg2[%c0_1, %c0_2] : memref<128x128xf32, #tpu.memory_space<vmem>>, vector<128x128xf32>
    %cst = arith.constant dense<0.000000e+00> : vector<16x128xf32>
    %2 = tpu.matmul %0, %1, %cst {dimension_numbers = #tpu.dot_dimension_numbers<[1], [0], [0], [1], [0, 0, 1, 1], [], []>} : vector<16x128xf32>, vector<128x128xf32>, vector<16x128xf32> -> vector<16x128xf32>
    %c0_3 = arith.constant 0 : index
    %c0_4 = arith.constant 0 : index
    %3 = vector.load %arg3[%c0_3, %c0_4] : memref<1x128xf32, #tpu.memory_space<vmem>>, vector<1x128xf32>
    %4 = vector.broadcast %3 : vector<1x128xf32> to vector<16x128xf32>
    %5 = arith.addf %2, %4 : vector<16x128xf32>
    %cst_5 = arith.constant 0.000000e+00 : f32
    %6 = vector.broadcast %cst_5 : f32 to vector<16x128xf32>
    %7 = arith.maximumf %5, %6 : vector<16x128xf32>
    %c0_6 = arith.constant 0 : index
    %c0_7 = arith.constant 0 : index
    %8 = vector.load %arg4[%c0_6, %c0_7] : memref<1x128xf32, #tpu.memory_space<vmem>>, vector<1x128xf32>
    %cst_8 = arith.constant dense<0.000000e+00> : vector<1x16xf32>
    %9 = tpu.matmul %8, %7, %cst_8 {dimension_numbers = #tpu.dot_dimension_numbers<[1], [1], [0], [0], [0, 0, 1, 0], [], []>} : vector<1x128xf32>, vector<16x128xf32>, vector<1x16xf32> -> vector<1x16xf32>
    %c0_9 = arith.constant 0 : index
    %c0_10 = arith.constant 0 : index
    %10 = vector.load %arg5[%c0_9, %c0_10] : memref<1x1xf32, #tpu.memory_space<vmem>>, vector<1x1xf32>
    %11 = vector.broadcast %10 : vector<1x1xf32> to vector<1x16xf32>
    %12 = arith.addf %9, %11 : vector<1x16xf32>
    %cst_11 = arith.constant 0.020833334 : f32
    %cst_12 = arith.constant 8.000000e+00 : f32
    %13 = vector.broadcast %cst_11 : f32 to vector<1x16xf32>
    %14 = arith.maximumf %13, %12 : vector<1x16xf32>
    %15 = vector.broadcast %cst_12 : f32 to vector<1x16xf32>
    %16 = arith.minimumf %15, %14 : vector<1x16xf32>
    %17 = vector.shape_cast %16 : vector<1x16xf32> to vector<1x1x16xf32>
    %c0_13 = arith.constant 0 : index
    %c0_14 = arith.constant 0 : index
    %c0_15 = arith.constant 0 : index
    %18 = vector.load %arg6[%c0_13, %c0_14, %c0_15] : memref<1x1x16xf32, #tpu.memory_space<vmem>>, vector<1x1x16xf32>
    tpu.vector_store %arg6[%c0_13, %c0_14, %c0_15], %17 {strides = array<i32>} : memref<1x1x16xf32, #tpu.memory_space<vmem>>, vector<1x1x16xf32>,
    return
  }
  func.func @transform_0(%arg0: i32) -> (i32, i32) {
    %c0_i32 = arith.constant 0 : i32
    %c0_i32_0 = arith.constant 0 : i32
    return %arg0, %c0_i32 : i32, i32
  }
  func.func @transform_1(%arg0: i32) -> (i32, i32) {
    %c0_i32 = arith.constant 0 : i32
    %c0_i32_0 = arith.constant 0 : i32
    %c0_i32_1 = arith.constant 0 : i32
    return %c0_i32, %c0_i32_0 : i32, i32
  }
  func.func @transform_2(%arg0: i32) -> (i32, i32) {
    %c0_i32 = arith.constant 0 : i32
    %c0_i32_0 = arith.constant 0 : i32
    %c0_i32_1 = arith.constant 0 : i32
    return %c0_i32, %c0_i32_0 : i32, i32
  }
  func.func @transform_3(%arg0: i32) -> (i32, i32) {
    %c0_i32 = arith.constant 0 : i32
    %c0_i32_0 = arith.constant 0 : i32
    %c0_i32_1 = arith.constant 0 : i32
    return %c0_i32, %c0_i32_0 : i32, i32
  }
  func.func @transform_4(%arg0: i32) -> (i32, i32) {
    %c0_i32 = arith.constant 0 : i32
    %c0_i32_0 = arith.constant 0 : i32
    %c0_i32_1 = arith.constant 0 : i32
    return %c0_i32, %c0_i32_0 : i32, i32
  }
  func.func @transform_5(%arg0: i32) -> (i32, i32, i32) {
    %c0_i32 = arith.constant 0 : i32
    %c0_i32_0 = arith.constant 0 : i32
    %c0_i32_1 = arith.constant 0 : i32
    return %arg0, %c0_i32, %c0_i32_0 : i32, i32, i32
  }
}

</mosaic_0001>

<bundles_post_ra>
// kernel: meta_los_forward.1
= control target key start
LH: loop header
LB: loop body
LE: loop exit
PB: predicated region body
PF: predicated region fallthrough
CT: control target
= control target key end

     0   :  { %s463_s0 = inlined_call_operand.vmem [shape: f32[16,128], index: 0, kind: input, shape index: {}]   ;;  %s464_s1 = inlined_call_operand.vmem [shape: f32[128,128], index: 1, kind: input, shape index: {}]   ;;  %s465_s2 = inlined_call_operand.vmem [shape: f32[1,128], index: 2, kind: input, shape index: {}]   ;;  %s466_s3 = inlined_call_operand.vmem [shape: f32[1,128], index: 3, kind: input, shape index: {}]   ;;  %s467_s4 = inlined_call_operand.<no memory space> [shape: f32[1,1], index: 4, kind: input, shape index: {}]   ;;  %s468_s5 = inlined_call_operand.hbm [shape: f32[1,1,16], index: 5, kind: output, shape index: {}]  }
   0x1   :  { %v10_v0 = vstv %s467_s4 }
   0x2   :  { %11 = vst [vmem:[#allocation2] sm:$0x1] %v10_v0 }
   0x3   :  { %v25_v1 = vld [vmem:[%s464_s1] sm:$0xff]  ;;  %v26_v2 = vld [vmem:[%s464_s1 + $0x8] sm:$0xff]  ;;  %v27_v3 = vld [vmem:[%s464_s1 + $0x10] sm:$0xff] }
   0x4   :  { %v288_v4 = vpack.c.bf16 %v26_v2, %v25_v1  ;;  %v28_v5 = vld [vmem:[%s464_s1 + $0x18] sm:$0xff]  ;;  %v29_v7 = vld [vmem:[%s464_s1 + $0x20] sm:$0xff]  ;;  %v30_v8 = vld [vmem:[%s464_s1 + $0x28] sm:$0xff] }
   0x5   :  { %v292_v6 = vpack.c.bf16 %v28_v5, %v27_v3  ;;  %v296_v9 = vpack.c.bf16 %v30_v8, %v29_v7  ;;  %v23_v10 = vld [vmem:[%s463_s0] sm:$0xff]  ;;  %v31_v11 = vld [vmem:[%s464_s1 + $0x30] sm:$0xff]  ;;  %v32_v12 = vld [vmem:[%s464_s1 + $0x38] sm:$0xff] }
   0x6   :  { %289 = vmatprep.subr.bf16.mxu0 %v288_v4  ;;  %278 = vmatprep.mubr.f32.mxu0 %v23_v10 }
   0x7   :  { %291 = vmatpush3.bf16.msra.mxu0 %v288_v4 }
   0x8   :  { %293 = vmatprep.subr.bf16.mxu0 %v292_v6 }
   0x9   :  { %12 = vsyncpa [#allocation4], 0  ;;  %v300_v13 = vpack.c.bf16 %v32_v12, %v31_v11  ;;  %v33_v14 = vld [vmem:[%s464_s1 + $0x40] sm:$0xff]  ;;  %v34_v15 = vld [vmem:[%s464_s1 + $0x48] sm:$0xff]  ;;  %v353_v27 = vmov 0.0|0.0   ;;  %vm354_vm0 = vmmov 0   ;;  %v132_v40 = vlaneseq }
   0xa   :  { %v304_v16 = vpack.c.bf16 %v34_v15, %v33_v14  ;;  %v35_v17 = vld [vmem:[%s464_s1 + $0x50] sm:$0xff]  ;;  %v36_v18 = vld [vmem:[%s464_s1 + $0x58] sm:$0xff]  ;;  %v37_v20 = vld [vmem:[%s464_s1 + $0x60] sm:$0xff]  ;;  %320 = vmatprep.subr.bf16.mxu1 %v353_v27  ;;  %v355_v28 = vmov 0.0   ;;  %v356_v30 = vmov 0   ;;  %vm208_vm1 = vcmask 122880  }
   0xb   :  { %295 = vmatpush3.bf16.msra.mxu0 %v292_v6  ;;  %v308_v19 = vpack.c.bf16 %v36_v18, %v35_v17  ;;  %v38_v21 = vld [vmem:[%s464_s1 + $0x68] sm:$0xff]  ;;  %v39_v23 = vld [vmem:[%s464_s1 + $0x70] sm:$0xff]  ;;  %v40_v24 = vld [vmem:[%s464_s1 + $0x78] sm:$0xff]  ;;  %285 = vmatprep.mubr.msk.f32.mxu1 %vm354_vm0, %v355_v28  ;;  %v133_v41 = vshrl.u32 %v132_v40, 7 }
   0xc   :  { %297 = vmatprep.subr.bf16.mxu0 %v296_v9  ;;  %v312_v22 = vpack.c.bf16 %v38_v21, %v37_v20  ;;  %v316_v25 = vpack.c.bf16 %v40_v24, %v39_v23  ;;  %v24_v26 = vld [vmem:[%s463_s0 + $0x8] sm:$0xff]  ;;  %v126_v29 = vld [vmem:[#allocation2] sm:$0x1]  ;;  %328 = vset.pattern.permute.xlu0 %v356_v30 }
   0xd   :  { %129 = vperm.xlu0 %328, %v126_v29   ;;  %v224_v31 = vld [vmem:[%s465_s2] ss:$0 sm:$0xff]  ;;  %v134_v42 = vsub.s32 0, %v133_v41  ;;  %s357_s2 = smov [#allocation3]  }
   0xe   :  { %v125_v39 = vld [vmem:[%s466_s3] sm:$0x1]  ;;  %s216_s6 = sshll.u32 %s357_s2, 4  ;;  %s217_s6 = int_to_ptr.vmem [resolvable:$true] %s216_s6 }
   0xf   :  { %299 = vmatpush3.bf16.msra.mxu0 %v296_v9  ;;  %s329_s7 = scalar_lea.vmem %s217_s6, 16  ;;  %s333_s8 = scalar_lea.vmem %s217_s6, 32 }
  0x10   :  { %301 = vmatprep.subr.bf16.mxu0 %v300_v13  ;;  %p330_p0 = scmp.ne.s32.totalorder %s217_s6, %s329_s7  ;;  %p334_p1 = scmp.lt.s32.totalorder %s217_s6, %s217_s6 }
  0x11   :  { %p335_p2 = scmp.lt.s32.totalorder %s333_s8, %s329_s7 }
  0x13   :  { %303 = vmatpush3.bf16.msra.mxu0 %v300_v13  ;;  %p336_p3 = por %p335_p2, %p334_p1 }
  0x14   :  { %305 = vmatprep.subr.bf16.mxu0 %v304_v16 }
  0x15   :  { %p337_p4 = pnand %p336_p3, %p330_p0 }
  0x17   :  { %307 = vmatpush3.bf16.msra.mxu0 %v304_v16 }
  0x18   :  { %309 = vmatprep.subr.bf16.mxu0 %v308_v19 }
  0x1b   :  { %311 = vmatpush3.bf16.msra.mxu0 %v308_v19 }
  0x1c   :  { %313 = vmatprep.subr.bf16.mxu0 %v312_v22 }
  0x1f   :  { %315 = vmatpush3.bf16.msra.mxu0 %v312_v22 }
  0x20   :  { %317 = vmatprep.subr.bf16.mxu0 %v316_v25 }
  0x23   :  { %319 = vmatpush3.bf16.msra.mxu0 %v316_v25 }
  0x26   :  { %279 = vmatmul.mubr.f32.vlgmr.msra.gmra.mrb[0].mxu0 %v24_v26 }
  0x8c   :  { %v130_v43 = vpop.permute.xlu0 %129 }
  0x8d   :  { %v135_v44 = vrot.slane %v130_v43, %v134_v42 }
  0xf9   :  { %v280_v32 = vpop.f32.mrb[0].mxu0 }
  0xfa   :  { %v120_v33 = vadd.f32 %v280_v32, %v224_v31  ;;  %v114_v34 = vpop.f32.mrb[1].mxu0 }
  0xfb   :  { %v115_v35 = vadd.f32 %v224_v31, %v114_v34 }
  0xfc   :  { %v124_v36 = vmax.f32 %v120_v33, 0.0 }
  0xfd   :  { %v123_v37 = vmax.f32 %v115_v35, 0.0 }
  0xff   :  { %v321_v38 = vpack.c.bf16 %v124_v36, %v123_v37 }
 0x101   :  { %322 = vmatpush3.bf16.xpose.msra.mxu1 %v321_v38 }
 0x108   :  { %286 = vmatmul.mubr.f32.vlgmr.msra.gmra.mrb[0].mxu1 %v125_v39 }
 0x1db   :  { %v202_v45 = vpop.f32.mrb[0].mxu1 }
 0x1dc   :  { %v203_v46 = vadd.f32 %v202_v45, %v135_v44  ;;  %v287_v47 = vpop.f32.mrb[1].mxu1 }
 0x1de   :  { %v206_v48 = vmax.f32 %v203_v46, 0.020833334 }
 0x1e0   :  { %v207_v49 = vmin.f32 %v206_v48, 8.0 }
 0x1e2   :  { %209 = vst.msk [vmem:[#allocation3] sm:$0x1] %vm208_vm1, %v207_v49 }
 0x1e3   :  { %340 = shalt.err (!%p337_p4)
}
 0x1e4   :  { %s341_s10 = scalar_lea.hbm %s468_s5, 16 }
 0x1e5   :  { %p342_p5 = scmp.ne.s32.totalorder %s468_s5, %s341_s10  ;;  %p345_p6 = scmp.lt.u32.totalorder %s341_s10, %s468_s5 }
 0x1e7   :  { %p347_p7 = pnand %p345_p6, %p342_p5 }
 0x1e9   :  { %350 = shalt.err (!%p347_p7)
}
 0x1ea   :  { %219 = dma.vmem_to_hbm [thread:$0]  %s217_s6, 16, %s468_s5, [#allocation4]  }
 0x1eb   :  { %351 = dma.done.wait [#allocation4], 16  }
 0x1ec   :  { %352 = vsyncadd [#allocation4], 4294967280 }
 0x1ed   :  { %223 = vsyncpa [#allocation4], 1 }

</bundles_post_ra>
